<compile_context>
chip_gen: v7x
topology: tpu7x:2x2x1
jax: 0.10.0
libtpu: 0.0.40
codegen_flags: <defaults>
</compile_context>

<pallas_src>
import math

import jax
import jax.numpy as jnp
from jax.experimental import pallas as pl
from jax.experimental.pallas import tpu as pltpu


def _attention_head_kernel(x_ref, wqkv_ref, bqkv_ref, o_ref):
    """One grid step = one batch element: fused QKV projection + attention."""
    S = x_ref.shape[1]
    hd = o_ref.shape[2]
    mxu_dtype = x_ref.dtype  # bf16 on the default path, f32 on the v5e path

    x2d = x_ref[0]  # (S, E)

    # Single fused QKV projection (N = 3*hd fills the 256-wide v6e/v7x MXU
    # columns), f32 accumulation; bias stays f32. The 1/sqrt(hd) attention
    # scale is already folded into the W_q / b_q slice by the wrapper.
    qkv = jnp.dot(x2d, wqkv_ref[...],
                  preferred_element_type=jnp.float32) + bqkv_ref[...]

    # Lane-aligned (multiples of hd = 128) slices -> free layout-wise.
    q = qkv[:, 0 * hd:1 * hd].astype(mxu_dtype)
    k = qkv[:, 1 * hd:2 * hd].astype(mxu_dtype)
    v = qkv[:, 2 * hd:3 * hd].astype(mxu_dtype)

    # scores[i, j] = <q_i, k_j>  (scale pre-folded, no explicit transpose).
    scores = jnp.einsum("qd,kd->qk", q, k, preferred_element_type=jnp.float32)

    # Numerically stable softmax in f32; division -> EUP approx reciprocal.
    m = jnp.max(scores, axis=-1, keepdims=True)
    e = jnp.exp(scores - m)
    denom = jnp.sum(e, axis=-1, keepdims=True)
    probs = e * pl.reciprocal(denom, approx=True)

    # attention dropout: identity at inference (p = 0.0).
    # TODO(synk): pltpu.prng_seed/prng_random_bits mask for training-mode dropout.

    ctx = jnp.dot(probs.astype(mxu_dtype), v,
                  preferred_element_type=jnp.float32)  # (S, hd)
    o_ref[0] = ctx.astype(o_ref.dtype)


def attention_head_forward(x, w_q, b_q, w_k, b_k, w_v, b_v, *,
                           compute_dtype=jnp.bfloat16, out_dtype=None):
    """x: (B, S, E). Returns (B, S, hd).

    compute_dtype: MXU operand dtype. bf16 (default) for v6e/v7x; pass
    jnp.float32 on v5e or for strict PyTorch parity. Accumulation is f32 either
    way. out_dtype: output dtype (defaults to x.dtype)."""
    B, S, E = x.shape
    hd = w_q.shape[1]
    out_dtype = x.dtype if out_dtype is None else out_dtype

    # Host-side, one-time: fold 1/sqrt(hd) into the query projection (in f32),
    # then fuse the three projections into a single (E, 3*hd) matmul.
    scale = 1.0 / math.sqrt(hd)
    w_qkv = jnp.concatenate([w_q * scale, w_k, w_v], axis=1)  # (E, 3*hd)
    b_qkv = jnp.concatenate([b_q * scale, b_k, b_v], axis=1)  # (1, 3*hd), f32

    x_c = x.astype(compute_dtype)
    w_c = w_qkv.astype(compute_dtype)
    b_c = b_qkv.astype(jnp.float32)  # bias stays f32 (tiny; better numerics)

    return pl.pallas_call(
        _attention_head_kernel,
        out_shape=jax.ShapeDtypeStruct((B, S, hd), out_dtype),
        grid_spec=pltpu.PrefetchScalarGridSpec(
            num_scalar_prefetch=0,
            grid=(B,),  # parallel batch axis: v7x dual-TC sharding + pipelining
            in_specs=[
                pl.BlockSpec((1, S, E), lambda b: (b, 0, 0)),    # x (per batch)
                pl.BlockSpec((E, 3 * hd), lambda b: (0, 0)),     # fused W_qkv
                pl.BlockSpec((1, 3 * hd), lambda b: (0, 0)),     # fused b_qkv
            ],
            out_specs=pl.BlockSpec((1, S, hd), lambda b: (b, 0, 0)),
        ),
        compiler_params=pltpu.CompilerParams(
            dimension_semantics=("parallel",),
            vmem_limit_bytes=32 * 1024 * 1024,
        ),
    )(x_c, w_c, b_c)


def _reference(x, w_q, b_q, w_k, b_k, w_v, b_v):
    """Pure-JAX reference mirroring the PyTorch forward (dropout = identity)."""
    hd = w_q.shape[1]
    q = jnp.einsum("bse,ed->bsd", x, w_q) + b_q[0]
    k = jnp.einsum("bse,ed->bsd", x, w_k) + b_k[0]
    v = jnp.einsum("bse,ed->bsd", x, w_v) + b_v[0]
    scores = jnp.einsum("bqd,bkd->bqk", q, k) / math.sqrt(hd)
    probs = jax.nn.softmax(scores, axis=-1)
    return jnp.einsum("bqk,bkd->bqd", probs, v)


if __name__ == "__main__":
    # Module hyperparameters: emb_dim=128, attention_head_size=128 (lane-dense),
    # dropout=0.0, bias=True. Small batch/seq for the demo.
    B, S, E = 2, 8, 128
    HEAD_SIZE = 128

    key = jax.random.PRNGKey(0)
    kx, k1, k2, k3, k4, k5, k6 = jax.random.split(key, 7)

    x = jax.random.normal(kx, (B, S, E), dtype=jnp.float32)

    def init_w(kk):
        return jax.random.normal(kk, (E, HEAD_SIZE), dtype=jnp.float32) / math.sqrt(E)

    def init_b(kk):
        return jax.random.normal(kk, (1, HEAD_SIZE), dtype=jnp.float32) * 0.01

    w_q, w_k, w_v = init_w(k1), init_w(k3), init_w(k5)
    b_q, b_k, b_v = init_b(k2), init_b(k4), init_b(k6)

    ref = _reference(x, w_q, b_q, w_k, b_k, w_v, b_v)

    # f32 operand path (v5e default / strict-parity check).
    out_f32 = attention_head_forward(x, w_q, b_q, w_k, b_k, w_v, b_v,
                                     compute_dtype=jnp.float32)
    out_f32 = jax.block_until_ready(out_f32)
    assert out_f32.shape == (B, S, HEAD_SIZE), out_f32.shape
    err_f32 = float(jnp.max(jnp.abs(out_f32 - ref)))
    assert jnp.allclose(out_f32, ref, atol=2e-3, rtol=2e-3), err_f32

    # bf16 MXU-operand default (v6e/v7x); f32 accumulation keeps it close —
    # loose tolerance reflects expected bf16 operand rounding, not a bug.
    out_bf16 = attention_head_forward(x, w_q, b_q, w_k, b_k, w_v, b_v)
    out_bf16 = jax.block_until_ready(out_bf16)
    assert out_bf16.shape == (B, S, HEAD_SIZE), out_bf16.shape
    err_bf16 = float(jnp.max(jnp.abs(out_bf16 - ref)))
    assert jnp.allclose(out_bf16, ref, atol=2e-1, rtol=5e-2), err_bf16

    print("KERNEL_OK")
</pallas_src>

<mosaic_0001>
module attributes {stable_mosaic.version = 11 : i64} {
  func.func @_attention_head_kernel(%arg0: i32, %arg1: memref<1x8x128xf32, #tpu.memory_space<vmem>>, %arg2: memref<128x384xf32, #tpu.memory_space<vmem>>, %arg3: memref<1x384xf32, #tpu.memory_space<vmem>>, %arg4: memref<1x8x128xf32, #tpu.memory_space<vmem>>) attributes {dimension_semantics = [#tpu.dimension_semantics<parallel>], iteration_bounds = array<i64: 2>, scalar_prefetch = 0 : i64, scratch_operands = 0 : i64, tpu.core_type = #tpu.core_type<tc>, window_params = [{transform_indices = @transform_0, window_bounds = array<i64: 1, 8, 128>}, {pipeline_mode = #tpu.pipeline_mode<synchronous>, transform_indices = @transform_1, window_bounds = array<i64: 128, 384>}, {pipeline_mode = #tpu.pipeline_mode<synchronous>, transform_indices = @transform_2, window_bounds = array<i64: 1, 384>}, {transform_indices = @transform_3, window_bounds = array<i64: 1, 8, 128>}]} {
    %c0 = arith.constant 0 : index
    %c0_0 = arith.constant 0 : index
    %c0_1 = arith.constant 0 : index
    %0 = vector.load %arg1[%c0, %c0_0, %c0_1] : memref<1x8x128xf32, #tpu.memory_space<vmem>>, vector<1x8x128xf32>
    %1 = vector.shape_cast %0 : vector<1x8x128xf32> to vector<8x128xf32>
    %c0_2 = arith.constant 0 : index
    %c0_3 = arith.constant 0 : index
    %2 = vector.load %arg2[%c0_2, %c0_3] : memref<128x384xf32, #tpu.memory_space<vmem>>, vector<128x384xf32>
    %cst = arith.constant dense<0.000000e+00> : vector<8x384xf32>
    %3 = tpu.matmul %1, %2, %cst {dimension_numbers = #tpu.dot_dimension_numbers<[1], [0], [0], [1], [0, 0, 1, 1], [], []>} : vector<8x128xf32>, vector<128x384xf32>, vector<8x384xf32> -> vector<8x384xf32>
    %c0_4 = arith.constant 0 : index
    %c0_5 = arith.constant 0 : index
    %4 = vector.load %arg3[%c0_4, %c0_5] : memref<1x384xf32, #tpu.memory_space<vmem>>, vector<1x384xf32>
    %5 = vector.broadcast %4 : vector<1x384xf32> to vector<8x384xf32>
    %6 = arith.addf %3, %5 : vector<8x384xf32>
    %7 = vector.extract_strided_slice %6 {offsets = [0, 0], sizes = [8, 128], strides = [1, 1]} : vector<8x384xf32> to vector<8x128xf32>
    %8 = vector.extract_strided_slice %6 {offsets = [0, 128], sizes = [8, 128], strides = [1, 1]} : vector<8x384xf32> to vector<8x128xf32>
    %9 = vector.extract_strided_slice %6 {offsets = [0, 256], sizes = [8, 128], strides = [1, 1]} : vector<8x384xf32> to vector<8x128xf32>
    "tpu.trace_start"() <{level = 10 : i32, message = "qd,kd->qk"}> : () -> ()
    %cst_6 = arith.constant dense<0.000000e+00> : vector<8x8xf32>
    %10 = tpu.matmul %7, %8, %cst_6 {dimension_numbers = #tpu.dot_dimension_numbers<[1], [1], [0], [0], [0, 0, 1, 0], [], []>} : vector<8x128xf32>, vector<8x128xf32>, vector<8x8xf32> -> vector<8x8xf32>
    "tpu.trace_stop"() : () -> ()
    %cst_7 = arith.constant dense<0xFF800000> : vector<8xf32>
    %11 = vector.multi_reduction <maximumf>, %10, %cst_7 [1] : vector<8x8xf32> to vector<8xf32>
    %12 = vector.shape_cast %11 : vector<8xf32> to vector<8x1xf32>
    %13 = vector.broadcast %12 : vector<8x1xf32> to vector<8x8xf32>
    %14 = arith.subf %10, %13 : vector<8x8xf32>
    %15 = math.exp %14 : vector<8x8xf32>
    %cst_8 = arith.constant dense<0.000000e+00> : vector<8xf32>
    %16 = vector.multi_reduction <add>, %15, %cst_8 [1] : vector<8x8xf32> to vector<8xf32>
    %17 = vector.shape_cast %16 : vector<8xf32> to vector<8x1xf32>
    %18 = tpu.reciprocal %17 {approx = true} : vector<8x1xf32> -> vector<8x1xf32>
    %19 = vector.broadcast %18 : vector<8x1xf32> to vector<8x8xf32>
    %20 = arith.mulf %15, %19 : vector<8x8xf32>
    %cst_9 = arith.constant dense<0.000000e+00> : vector<8x128xf32>
    %21 = tpu.matmul %20, %9, %cst_9 {dimension_numbers = #tpu.dot_dimension_numbers<[1], [0], [0], [1], [0, 0, 1, 1], [], []>} : vector<8x8xf32>, vector<8x128xf32>, vector<8x128xf32> -> vector<8x128xf32>
    %c0_10 = arith.constant 0 : index
    %c0_11 = arith.constant 0 : index
    %c0_12 = arith.constant 0 : index
    %22 = vector.load %arg4[%c0_10, %c0_11, %c0_12] : memref<1x8x128xf32, #tpu.memory_space<vmem>>, vector<1x8x128xf32>
    %23 = vector.shape_cast %22 : vector<1x8x128xf32> to vector<8x128xf32>
    %24 = vector.shape_cast %21 : vector<8x128xf32> to vector<1x8x128xf32>
    tpu.vector_store %arg4[%c0_10, %c0_11, %c0_12], %24 {strides = array<i32>} : memref<1x8x128xf32, #tpu.memory_space<vmem>>, vector<1x8x128xf32>,
    return
  }
  func.func @transform_0(%arg0: i32) -> (i32, i32, i32) {
    %c0_i32 = arith.constant 0 : i32
    %c0_i32_0 = arith.constant 0 : i32
    %c0_i32_1 = arith.constant 0 : i32
    return %arg0, %c0_i32, %c0_i32_0 : i32, i32, i32
  }
  func.func @transform_1(%arg0: i32) -> (i32, i32) {
    %c0_i32 = arith.constant 0 : i32
    %c0_i32_0 = arith.constant 0 : i32
    %c0_i32_1 = arith.constant 0 : i32
    return %c0_i32, %c0_i32_0 : i32, i32
  }
  func.func @transform_2(%arg0: i32) -> (i32, i32) {
    %c0_i32 = arith.constant 0 : i32
    %c0_i32_0 = arith.constant 0 : i32
    %c0_i32_1 = arith.constant 0 : i32
    return %c0_i32, %c0_i32_0 : i32, i32
  }
  func.func @transform_3(%arg0: i32) -> (i32, i32, i32) {
    %c0_i32 = arith.constant 0 : i32
    %c0_i32_0 = arith.constant 0 : i32
    %c0_i32_1 = arith.constant 0 : i32
    return %arg0, %c0_i32, %c0_i32_0 : i32, i32, i32
  }
}

</mosaic_0001>

<bundles_post_ra>
// kernel: tpu_custom_call.1
= control target key start
LH: loop header
LB: loop body
LE: loop exit
PB: predicated region body
PF: predicated region fallthrough
CT: control target
= control target key end

     0   :  { %8 = vsyncpa [#allocation3], 0  ;;  %s1247_s0 = inlined_call_operand.hbm [shape: f32[2,8,128], index: 0, kind: input, shape index: {}]   ;;  %s1248_s1 = inlined_call_operand.hbm [shape: f32[128,384], index: 1, kind: input, shape index: {}]   ;;  %s1249_s2 = inlined_call_operand.vmem [shape: f32[1,384], index: 2, kind: input, shape index: {}]   ;;  %s1250_s3 = inlined_call_operand.hbm [shape: f32[2,8,128], index: 3, kind: output, shape index: {}]  }
   0x1   :  { %10 = vsyncpa [#allocation3 + $0x1], 0 }
   0x2   :  { %11 = vsyncpa [#allocation6], 0 }
   0x3   :  { %12 = vsyncpa [#allocation4], 0 }
   0x4   :  { %14 = vsyncpa [#allocation4 + $0x1], 0  ;;  %s1019_s12 = smov 0   ;;  %s1021_s13 = smov 0  }
   0x5   :  { %s1023_s14 = smov 0   ;;  %s1025_s15 = smov 0  }
   0x6 LB: > { %s1040_s16 = sadd.s32 4294967295, %s989_s15   ;;  %s658_s17 = sadd.s32 4294967294, %s989_s15   ;;  %s989_s15 = sphi %s1025_s15, %s1270_s15   ;;  %s985_s14 = sphi %s1023_s14, %s1269_s14   ;;  %s981_s13 = sphi %s1021_s13, %s1268_s13   ;;  %s977_s12 = sphi %s1019_s12, %s1267_s12  }
   0x7   : > { %p40_p0 = scmp.ne.s32.totalorder %s981_s13, %s977_s12  ;;  %p1251_p1 = scmp.eq.s32.totalorder %s1040_s16, 0 }
   0x8   : > { %p112_p3 = scmp.eq.s32.totalorder %s658_s17, 1  ;;  %p659_p5 = scmp.ge.s32.totalorder %s989_s15, 1 }
   0x9   : > { %p1049_p4 = por %p1251_p1, %p40_p0  ;;  %p119_p7 = scmp.lt.s32.totalorder %s989_s15, 3 }
   0xa   : > { %p1054_p6 = por %p112_p3, %p40_p0  ;;  %s991_s21 = smov [#allocation5]  }
   0xb   : > { %s1254_s18 = scalar_select %p1049_p4, 1, 0 }
   0xc   : > { %s1255_s19 = scalar_select %p1054_p6, 1, 0 }
   0xd   : > { %p1059_p8 = pnand %p659_p5, %p119_p7  ;;  %s131_s22 = sshll.u32 %s991_s21, 4  ;;  %s1063_s22 = int_to_ptr.vmem [resolvable:$true] %s131_s22 }
   0xe   : > { %s1075_s24 = sadd.s32 1, %s989_s15   ;;  %s27_s25 = sadd.s32 1, %s985_s14 }
   0xf   : > { %s1256_s20 = scalar_select %p1059_p8, 1, 0 }
  0x10   : > { %p803_p9 = pneg %p1059_p8  ;;  %s24_s26 = ssub.s32 %s989_s15, %s1075_s24 }
  0x11   : > { %s861_s29 = scalar_lea.hbm %s1248_s1, 6144 }
  0x12   : > { %p1070_p11 = pnand %p803_p9, %p1251_p1  ;;  %p862_p12 = scmp.ne.s32.totalorder %s1248_s1, %s861_s29 }
  0x13   : > { %p868_p5 = scmp.lt.u32.totalorder %s861_s29, %s1248_s1 }
  0x14   : > { %p863_p13 = pneg %p1070_p11 }
  0x16   : > { %p864_p0 = pnand %p863_p13, %p862_p12 }
  0x18   : > { %p865_p3 = pneg %p864_p0 }
  0x1a   : > { %p870_p7 = pnand %p868_p5, %p865_p3 }
  0x1c   : > { %873 = shalt.err (!%p870_p7)
}
  0x1d   : > { %s874_s7 = scalar_lea.vmem %s1063_s22, 6144  ;;  %p882_p2 = scmp.lt.s32.totalorder %s1063_s22, %s1063_s22 }
  0x1e   : > { %p875_p9 = scmp.ne.s32.totalorder %s1063_s22, %s874_s7  ;;  %p883_p6 = scmp.lt.s32.totalorder %s874_s7, %s874_s7 }
  0x20   : > { %p877_p10 = pnand %p875_p9, %p863_p13  ;;  %p884_p4 = por %p883_p6, %p882_p2 }
  0x22   : > { %p878_p1 = pneg %p877_p10 }
  0x24   : > { %p885_p8 = pnand %p884_p4, %p878_p1 }
  0x26   : > { %888 = shalt.err (!%p885_p8)
}
  0x27   : > { %s992_s8 = smov 384   ;;  %s993_s9 = smov 24  }
  0x28   : > { %806 = dma.hbm_to_vmem [thread:$0]  (!%p1070_p11), %s1248_s1, 6144, %s1063_s22, [#allocation6], %s992_s8, %s992_s8, %s993_s9  }
  0x29   : > { %p25_p2 = scmp.eq.s32.totalorder %s24_s26, 0  ;;  %p34_p1 = scmp.ne.s32.totalorder %s985_s14, %s981_s13 }
  0x2a   : > { %p35_p4 = scmp.eq.s32.totalorder %s989_s15, 0  ;;  %p816_p6 = scmp.lt.s32.totalorder %s989_s15, 2 }
  0x2b   : > { %s1106_s17 = scalar_select %p25_p2, %s985_s14, %s27_s25  }
  0x2c   : > { %p36_p8 = por %p35_p4, %p34_p1  ;;  %p1258_p10 = scmp.eq.s32.totalorder %s1040_s16, 1 }
  0x2d   : > { %s148_s27 = sand.u32 1, %s985_s14   ;;  %s663_s28 = sshll.u32 %s989_s15, 7 }
  0x2e   : > { %p1110_p12 = por %p1258_p10, %p34_p1  ;;  %s662_s29 = sshll.u32 %s148_s27, 3 }
  0x2f   : > { %s1119_s4 = scalar_lea.hbm %s1247_s0, %s663_s28  ;;  %s152_s22 = scalar_lea.vmem [#allocation2], %s662_s29 }
  0x30   : > { %s159_s25 = sshll.u32 %s152_s22, 4  ;;  %p1121_p11 = pnand %p816_p6, %p36_p8  ;;  %s1125_s25 = int_to_ptr.vmem [resolvable:$true] %s159_s25 }
  0x31   : > { %s149_s5 = scalar_lea.sflag [#allocation3], %s148_s27  ;;  %s889_s6 = scalar_lea.hbm %s1119_s4, 128 }
  0x32   : > { %p890_p13 = scmp.ne.s32.totalorder %s1119_s4, %s889_s6  ;;  %p891_p0 = pneg %p1121_p11 }
  0x33   : > { %s894_s9 = scalar_lea.hbm %s1247_s0, 256  ;;  %p895_p7 = scmp.lt.u32.totalorder %s1119_s4, %s1247_s0 }
  0x34   : > { %p892_p3 = pnand %p891_p0, %p890_p13  ;;  %p896_p9 = scmp.lt.u32.totalorder %s894_s9, %s889_s6 }
  0x35   : > { %p898_p1 = scmp.lt.u32.totalorder %s889_s6, %s1119_s4 }
  0x36   : > { %p893_p5 = pneg %p892_p3  ;;  %p897_p2 = por %p896_p9, %p895_p7 }
  0x38   : > { %p899_p4 = por %p898_p1, %p897_p2 }
  0x3a   : > { %p900_p6 = pnand %p899_p4, %p893_p5 }
  0x3c   : > { %903 = shalt.err (!%p900_p6)
}
  0x3d   : > { %s904_s27 = scalar_lea.vmem %s1125_s25, 128  ;;  %s994_s28 = smov [#allocation2]  }
  0x3e   : > { %p905_p8 = scmp.ne.s32.totalorder %s1125_s25, %s904_s27  ;;  %s909_s29 = sshll.u32 %s994_s28, 4  ;;  %s910_s29 = int_to_ptr.vmem [resolvable:$false] %s909_s29 }
  0x3f   : > { %s911_s23 = scalar_lea.vmem %s910_s29, 256  ;;  %p912_p3 = scmp.lt.s32.totalorder %s1125_s25, %s910_s29 }
  0x40   : > { %p907_p10 = pnand %p905_p8, %p891_p0  ;;  %p913_p7 = scmp.lt.s32.totalorder %s911_s23, %s904_s27 }
  0x42   : > { %p908_p13 = pneg %p907_p10  ;;  %p914_p9 = por %p913_p7, %p912_p3 }
  0x44   : > { %p915_p2 = pnand %p914_p9, %p908_p13 }
  0x46   : > { %918 = shalt.err (!%p915_p2)
}
  0x47   : > { %810 = dma.hbm_to_vmem [thread:$0]  (!%p1121_p11), %s1119_s4, 128, %s1125_s25, %s149_s5  }
  0x48   : > { %p1261_p5 = scmp.ne.s32.totalorder %s1256_s20, 0 }
  0x49   : > { %s1155_s30 = sand.u32 (!%p1261_p5), 1, %s981_s13   ;;  %p1262_p0 = scmp.ne.s32.totalorder (!%p1261_p5), %s1254_s18, 0 }
  0x4a   : > { %168 = sbr.rel (%p1261_p5) target bundleno = 1090 (0x442), region = 32  ;;  %s665_s22 = sshll.u32 (!%p1261_p5), %s1155_s30, 3 }
  0x4b   : > { %s171_s6 = scalar_lea.sflag (!%p1261_p5), [#allocation3], %s1155_s30  ;;  %s1161_s7 = scalar_lea.vmem (!%p1261_p5), [#allocation2], %s665_s22 }
  0x51   : > { %964 = dma.done.wait (%p1262_p0), %s171_s6, 128  }
  0x52   : > { %966 = vsyncadd (%p1262_p0), %s171_s6, 4294967168  ;;  %p1263_p11 = scmp.eq.s32.totalorder %s1040_s16, 0 }
  0x54   : > { %968 = dma.done.wait (%p1263_p11), [#allocation6], 6144   ;;  %p1264_p1 = pmov %p1263_p11 }
  0x55   : > { %v995_v0 = vmov 0.0   ;;  %v203_v1 = vld [vmem:[#allocation5 + $0x8] sm:$0xff]  ;;  %v206_v2 = vld [vmem:[#allocation5 + $0x20] sm:$0xff]  ;;  %v205_v5 = vld [vmem:[#allocation5 + $0x18] sm:$0xff]  ;;  %vm996_vm0 = vmmov 0   ;;  %v252_v50 = vlaneseq  ;;  %vm478_vm1 = vcmask 64512  }
  0x56   : > { %970 = vsyncadd (%p1264_p1), [#allocation6], 4294961152  ;;  %331 = vmatprep.mubr.f32.mxu0 %v995_v0  ;;  %v202_v3 = vld [vmem:[#allocation5] sm:$0xff]  ;;  %v739_v4 = vpack.c.bf16 %v206_v2, %v203_v1  ;;  %v209_v6 = vld [vmem:[#allocation5 + $0x38] sm:$0xff]  ;;  %726 = vmatprep.mubr.msk.f32.mxu1 %vm996_vm0, %v995_v0  ;;  %v997_v1 = vmov 0.0|0.0   ;;  %s200_s4 = scalar_lea.vmem [#allocation7], %s665_s22 }
  0x57   : > { %v212_v7 = vld [vmem:[#allocation5 + $0x50] sm:$0xff]  ;;  %v741_v8 = vpack.c.bf16 %v205_v5, %v202_v3  ;;  %v211_v11 = vld [vmem:[#allocation5 + $0x48] sm:$0xff]  ;;  %v218_v13 = vld [vmem:[#allocation5 + $0x80] sm:$0xff]  ;;  %v1178_v51 = vshrl.u32 %v252_v50, 7  ;;  %771 = vmatprep.subr.bf16.mxu1 %v997_v1  ;;  %s578_s25 = sshll.u32 %s200_s4, 4  ;;  %s670_s26 = sshll.u32 %s1040_s16, 7  ;;  %s1200_s25 = int_to_ptr.vmem [resolvable:$true] %s578_s25 }
  0x58   : > { %v743_v9 = vpack.c.bf16 %v212_v7, %v209_v6  ;;  %v208_v10 = vld [vmem:[#allocation5 + $0x30] sm:$0xff]  ;;  %v215_v12 = vld [vmem:[#allocation5 + $0x68] sm:$0xff]  ;;  %740 = vmatprep.subr.bf16.mxu0 %v739_v4  ;;  %v214_v16 = vld [vmem:[#allocation5 + $0x60] sm:$0xff]  ;;  %s1205_s9 = scalar_lea.hbm %s1250_s3, %s670_s26  ;;  %s565_s10 = scalar_lea.sflag [#allocation4], %s1155_s30 }
  0x59   : > { %742 = vmatpush1.bf16.msra.mxu0 %v741_v8  ;;  %v745_v14 = vpack.c.bf16 %v211_v11, %v208_v10  ;;  %v747_v15 = vpack.c.bf16 %v218_v13, %v215_v12  ;;  %v217_v17 = vld [vmem:[#allocation5 + $0x78] sm:$0xff]  ;;  %v224_v19 = vld [vmem:[#allocation5 + $0xb0] sm:$0xff]  ;;  %v223_v23 = vld [vmem:[#allocation5 + $0xa8] sm:$0xff]  ;;  %v258_v52 = vsub.s32 1, %v1178_v51  ;;  %v254_v54 = vsub.s32 0, %v1178_v51  ;;  %s919_s11 = scalar_lea.vmem %s1200_s25, 128 }
  0x5a   : > { %744 = vmatprep.subr.bf16.mxu0 %v743_v9  ;;  %v221_v18 = vld [vmem:[#allocation5 + $0x98] sm:$0xff]  ;;  %v749_v20 = vpack.c.bf16 %v217_v17, %v214_v16  ;;  %v220_v22 = vld [vmem:[#allocation5 + $0x90] sm:$0xff]  ;;  %v227_v24 = vld [vmem:[#allocation5 + $0xc8] sm:$0xff]  ;;  %p920_p4 = scmp.ne.s32.totalorder %s1200_s25, %s919_s11  ;;  %s998_s16 = smov [#allocation7]  }
  0x5b   : > { %v751_v21 = vpack.c.bf16 %v224_v19, %v221_v18  ;;  %v230_v25 = vld [vmem:[#allocation5 + $0xe0] sm:$0xff]  ;;  %v753_v26 = vpack.c.bf16 %v223_v23, %v220_v22  ;;  %v229_v29 = vld [vmem:[#allocation5 + $0xd8] sm:$0xff]  ;;  %v236_v31 = vld [vmem:[#allocation5 + $0x110] sm:$0xff]  ;;  %s923_s27 = sshll.u32 %s998_s16, 4  ;;  %s924_s27 = int_to_ptr.vmem [resolvable:$false] %s923_s27 }
  0x5c   : > { %v755_v27 = vpack.c.bf16 %v230_v25, %v227_v24  ;;  %v226_v28 = vld [vmem:[#allocation5 + $0xc0] sm:$0xff]  ;;  %v233_v30 = vld [vmem:[#allocation5 + $0xf8] sm:$0xff]  ;;  %v232_v34 = vld [vmem:[#allocation5 + $0xf0] sm:$0xff]  ;;  %p921_p6 = pnand %p920_p4, %p1110_p12  ;;  %s925_s28 = scalar_lea.vmem %s924_s27, 256 }
  0x5d   : > { %746 = vmatpush1.bf16.msra.mxu0 %v745_v14  ;;  %v757_v32 = vpack.c.bf16 %v229_v29, %v226_v28  ;;  %v759_v33 = vpack.c.bf16 %v236_v31, %v233_v30  ;;  %v235_v35 = vld [vmem:[#allocation5 + $0x108] sm:$0xff]  ;;  %v242_v37 = vld [vmem:[#allocation5 + $0x140] sm:$0xff]  ;;  %v241_v41 = vld [vmem:[#allocation5 + $0x138] sm:$0xff]  ;;  %v262_v31 = vsub.s32 2, %v1178_v51  ;;  %p926_p10 = scmp.lt.s32.totalorder %s1200_s25, %s924_s27  ;;  %p927_p13 = scmp.lt.s32.totalorder %s925_s28, %s919_s11 }
  0x5e   : > { %748 = vmatprep.subr.bf16.mxu0 %v747_v15  ;;  %v239_v36 = vld [vmem:[#allocation5 + $0x128] sm:$0xff]  ;;  %v761_v38 = vpack.c.bf16 %v235_v35, %v232_v34  ;;  %v238_v40 = vld [vmem:[#allocation5 + $0x120] sm:$0xff]  ;;  %v245_v42 = vld [vmem:[#allocation5 + $0x158] sm:$0xff]  ;;  %p922_p8 = pneg %p921_p6 }
  0x5f   : > { %v763_v39 = vpack.c.bf16 %v242_v37, %v239_v36  ;;  %v248_v43 = vld [vmem:[#allocation5 + $0x170] sm:$0xff]  ;;  %v765_v44 = vpack.c.bf16 %v241_v41, %v238_v40  ;;  %v247_v47 = vld [vmem:[#allocation5 + $0x168] sm:$0xff]  ;;  %v210_v63 = vld [vmem:[#allocation5 + $0x40] sm:$0xff]  ;;  %p928_p3 = por %p927_p13, %p926_p10 }
  0x60   : > { %v767_v45 = vpack.c.bf16 %v248_v43, %v245_v42  ;;  %v244_v46 = vld [vmem:[#allocation5 + $0x150] sm:$0xff]  ;;  %v207_v62 = vld [vmem:[#allocation5 + $0x28] sm:$0xff]  ;;  %v213_v3 = vld [vmem:[#allocation5 + $0x58] sm:$0xff] }
  0x61   : > { %750 = vmatpush1.bf16.msra.mxu0 %v749_v20  ;;  %v769_v48 = vpack.c.bf16 %v247_v47, %v244_v46  ;;  %v201_v49 = vld [vmem:[%s1161_s7] sm:$0xff]  ;;  %v775_v4 = vpack.c.bf16 %v213_v3, %v210_v63  ;;  %v219_v6 = vld [vmem:[#allocation5 + $0x88] sm:$0xff]  ;;  %v222_v8 = vld [vmem:[#allocation5 + $0xa0] sm:$0xff]  ;;  %p929_p7 = pnand %p928_p3, %p922_p8 }
  0x62   : > { %752 = vmatprep.subr.bf16.mxu0 %v751_v21  ;;  %v1184_v53 = vld [vmem:[%s1249_s2] sm:$0x7]  ;;  %v225_v9 = vld [vmem:[#allocation5 + $0xb8] sm:$0xff]  ;;  %v231_v12 = vld [vmem:[#allocation5 + $0xe8] sm:$0xff] }
  0x63   : > { %v259_v55 = vrot.slane %v1184_v53, %v258_v52  ;;  %v255_v57 = vrot.slane %v1184_v53, %v254_v54  ;;  %v204_v61 = vld [vmem:[#allocation5 + $0x10] sm:$0xff]  ;;  %v781_v10 = vpack.c.bf16 %v225_v9, %v222_v8  ;;  %v234_v14 = vld [vmem:[#allocation5 + $0x100] sm:$0xff]  ;;  %v237_v15 = vld [vmem:[#allocation5 + $0x118] sm:$0xff] }
  0x64   : > { %v772_v2 = vpack.c.bf16 %v207_v62, %v204_v61  ;;  %v216_v5 = vld [vmem:[#allocation5 + $0x70] sm:$0xff]  ;;  %v787_v16 = vpack.c.bf16 %v237_v15, %v234_v14  ;;  %v243_v18 = vld [vmem:[#allocation5 + $0x148] sm:$0xff]  ;;  %v246_v20 = vld [vmem:[#allocation5 + $0x160] sm:$0xff] }
  0x65   : > { %754 = vmatpush1.bf16.msra.mxu0 %v753_v26  ;;  %v778_v7 = vpack.c.bf16 %v219_v6, %v216_v5  ;;  %v228_v11 = vld [vmem:[#allocation5 + $0xd0] sm:$0xff]  ;;  %v249_v21 = vld [vmem:[#allocation5 + $0x178] sm:$0xff] }
  0x66   : > { %756 = vmatprep.subr.bf16.mxu0 %v755_v27  ;;  %773 = vmatpush3.bf16.msra.mxu1 %v772_v2  ;;  %v784_v13 = vpack.c.bf16 %v231_v12, %v228_v11  ;;  %v240_v17 = vld [vmem:[#allocation5 + $0x130] sm:$0xff]  ;;  %v793_v22 = vpack.c.bf16 %v249_v21, %v246_v20 }
  0x67   : > { %774 = vmatprep.subr.bf16.mxu1 %v997_v1  ;;  %v790_v19 = vpack.c.bf16 %v243_v18, %v240_v17 }
  0x69   : > { %758 = vmatpush1.bf16.msra.mxu0 %v757_v32 }
  0x6a   : > { %760 = vmatprep.subr.bf16.mxu0 %v759_v33  ;;  %776 = vmatpush3.bf16.msra.mxu1 %v775_v4 }
  0x6b   : > { %777 = vmatprep.subr.bf16.mxu1 %v997_v1 }
  0x6d   : > { %762 = vmatpush1.bf16.msra.mxu0 %v761_v38 }
  0x6e   : > { %764 = vmatprep.subr.bf16.mxu0 %v763_v39  ;;  %779 = vmatpush3.bf16.msra.mxu1 %v778_v7 }
  0x6f   : > { %780 = vmatprep.subr.bf16.mxu1 %v997_v1 }
  0x71   : > { %766 = vmatpush1.bf16.msra.mxu0 %v765_v44 }
  0x72   : > { %768 = vmatprep.subr.bf16.mxu0 %v767_v45  ;;  %782 = vmatpush3.bf16.msra.mxu1 %v781_v10 }
  0x73   : > { %783 = vmatprep.subr.bf16.mxu1 %v997_v1 }
  0x75   : > { %770 = vmatpush1.bf16.msra.mxu0 %v769_v48 }
  0x76   : > { %729 = vmatprep.subr.mxu0 %v995_v0  ;;  %785 = vmatpush3.bf16.msra.mxu1 %v784_v13 }
  0x77   : > { %786 = vmatprep.subr.bf16.mxu1 %v997_v1 }
  0x78   : > { %332 = vmatmul.mubr.f32.vlgmr.msra.gmra.mrb[0].mxu0 %v201_v49 }
  0x79   : > { %731 = vmatprep.mubr.msk.f32.mxu0 %vm996_vm0, %v995_v0 }
  0x7a   : > { %788 = vmatpush3.bf16.msra.mxu1 %v787_v16 }
  0x7b   : > { %789 = vmatprep.subr.bf16.mxu1 %v997_v1 }
  0x7e   : > { %791 = vmatpush3.bf16.msra.mxu1 %v790_v19 }
  0x7f   : > { %792 = vmatprep.subr.bf16.mxu1 %v997_v1 }
  0x82   : > { %794 = vmatpush3.bf16.msra.mxu1 %v793_v22 }
  0x83   : > { %734 = vmatprep.subr.mxu1 %v995_v0 }
  0x85   : > { %727 = vmatmul.mubr.f32.vlgmr.msra.gmra.mrb[0].mxu1 %v201_v49 }
  0x86   : > { %736 = vmatprep.mubr.msk.f32.mxu1 %vm996_vm0, %v995_v0  ;;  %v263_v0 = vrot.slane %v1184_v53, %v262_v31 }
 0x14b   : > { %v333_v56 = vpop.f32.mrb[0].mxu0 }
 0x14c   : > { %v335_v58 = vpop.f32.mrb[1].mxu0  ;;  %v334_v60 = vadd.f32 %v333_v56, %v255_v57 }
 0x14d   : > { %v336_v59 = vadd.f32 %v335_v58, %v259_v55 }
 0x14f   : > { %730 = vmatpush3.xpose.msra.mxu0 %v336_v59 }
 0x152   : > { %732 = vmatmul.mubr.f32.vlgmr.msra.gmra.mrb[2].mxu0 %v334_v60 }
 0x158   : > { %v404_v32 = vpop.f32.mrb[0].mxu1 }
 0x159   : > { %v728_v33 = vpop.f32.mrb[1].mxu1  ;;  %v405_v34 = vadd.f32 %v404_v32, %v263_v0 }
 0x15b   : > { %735 = vmatpush3.msra.mxu1 %v405_v34 }
 0x225   : > { %v474_v23 = vpop.f32.mrb[2].mxu0 }
 0x226   : > { %v733_v24 = vpop.f32.mrb[3].mxu0  ;;  %v479_v25 = vsel %vm478_vm1, %v474_v23, -inf }
 0x227   : > { %480 = vmax.xlane.f32.xlu0 %v479_v25 }
 0x2b4   : > { %v481_v26 = vpop.xlane.xlu0 %480 }
 0x2b5   : > { %v482_v27 = vsub.f32 %v474_v23, %v481_v26 }
 0x2b7   : > { %v483_v28 = vmul.f32 1.442695, %v482_v27 }
 0x2b9   : > { %857 = vpow2.f32 %v483_v28 }
 0x2c3   : > { %v858_v29 = vpop.eup %857 }
 0x2c4   : > { %v485_v30 = vsel %vm478_vm1, %v858_v29, 0.0 }
 0x2c5   : > { %486 = vadd.xlane.f32.xlu0 %v485_v30 }
 0x352   : > { %v487_v35 = vpop.xlane.xlu0 %486 }
 0x353   : > { %859 = vrcp.f32 %v487_v35 }
 0x35d   : > { %v860_v36 = vpop.eup %859 }
 0x35e   : > { %v489_v37 = vmul.f32 %v860_v36, %v858_v29 }
 0x360   : > { %737 = vmatmul.mubr.msk.f32.vlgmr.msra.gmra.mrb[2].mxu1 %vm478_vm1, %v489_v37 }
 0x433   : > { %v559_v38 = vpop.f32.mrb[2].mxu1 }
 0x434   : > { %563 = vst [vmem:[%s200_s4] sm:$0xff] %v559_v38  ;;  %v738_v39 = vpop.f32.mrb[3].mxu1 }
 0x435   : > { %932 = shalt.err (!%p929_p7)
}
 0x436   : > { %s933_s29 = scalar_lea.hbm %s1205_s9, 128  ;;  %s937_s22 = scalar_lea.hbm %s1250_s3, 256 }
 0x437   : > { %p934_p9 = scmp.ne.s32.totalorder %s1205_s9, %s933_s29  ;;  %p938_p0 = scmp.lt.u32.totalorder %s1205_s9, %s1250_s3 }
 0x438   : > { %p939_p11 = scmp.lt.u32.totalorder %s937_s22, %s933_s29  ;;  %p941_p4 = scmp.lt.u32.totalorder %s933_s29, %s1205_s9 }
 0x439   : > { %p935_p2 = pnand %p934_p9, %p1110_p12 }
 0x43a   : > { %p940_p1 = por %p939_p11, %p938_p0 }
 0x43b   : > { %p936_p5 = pneg %p935_p2 }
 0x43c   : > { %p942_p6 = por %p941_p4, %p940_p1 }
 0x43e   : > { %p943_p8 = pnand %p942_p6, %p936_p5 }
 0x440   : > { %946 = shalt.err (!%p943_p8)
}
 0x441   : > { %801 = dma.vmem_to_hbm [thread:$0]  (%p1110_p12), %s1200_s25, 128, %s1205_s9, %s565_s10  }
 0x442 PF: > { %s590_s18 = sand.u32 1, %s977_s12   ;;  %p1265_p10 = scmp.ne.s32.totalorder %s1255_s19, 0 }
 0x443   : > { %p1266_p13 = scmp.ge.s32.totalorder %s989_s15, 2  ;;  %s591_s20 = scalar_lea.sflag [#allocation4], %s590_s18 }
 0x445   : > { %p812_p3 = pnand %p1266_p13, %p1265_p10 }
 0x447   : > { %972 = dma.done.wait (!%p812_p3), %s591_s20, 128  }
 0x448   : > { %974 = vsyncadd (!%p812_p3), %s591_s20, 4294967168  ;;  %p17_p7 = scmp.ge.s32.totalorder %s1075_s24, 4   ;;  %s1267_s12 = smov %s981_s13 }
 0x449   : > { %s1268_s13 = smov %s985_s14  ;;  %s1269_s14 = smov %s1106_s17 }
 0x44a   : > { %s1270_s15 = smov %s1075_s24  ;;  %19 = sbr.rel (!%p17_p7) target bundleno = 6 (0x6), region = 81 }
 0x451   :  { %596 = vsyncpa [#allocation3], 1 }
 0x452   :  { %598 = vsyncpa [#allocation3 + $0x1], 1 }
 0x453   :  { %599 = vsyncpa [#allocation6], 1 }
 0x454   :  { %600 = vsyncpa [#allocation4], 1 }
 0x455   :  { %602 = vsyncpa [#allocation4 + $0x1], 1 }

</bundles_post_ra>
